<compile_context>
chip_gen: v7x
topology: tpu7x:2x2x1
jax: 0.10.0
libtpu: 0.0.40
codegen_flags: <defaults>
</compile_context>

<pallas_src>
import functools

import jax
import jax.numpy as jnp
from jax.experimental import pallas as pl
from jax.experimental.pallas import tpu as pltpu

_SUB = 256      # rows per in-kernel matmul sub-chunk (multiple of 8; 2 output vregs)
_LANES = 128    # replication width of the stationary weight / MXU N dim


def _mean_emb_classifier_kernel(x_ref, w_ref, b_ref, o_ref, *, sub_rows):
    # x_ref: (TB, D) VMEM     — streaming activations (MXU LHS, K=D in lanes)
    # w_ref: (D, 128) VMEM    — weight column replicated across 128 lanes (stationary RHS)
    # b_ref: (1, 1) SMEM      — scalar bias
    # o_ref: (1, TB) VMEM     — lane-dense sigmoid(logits) row for this tile
    b = b_ref[0, 0]
    n_sub = o_ref.shape[1] // sub_rows
    for c in range(n_sub):                      # static unroll; short live ranges
        xc = x_ref[c * sub_rows:(c + 1) * sub_rows, :]          # (SUB, D)
        # MXU-native matmul: no transpose of the activation tile is ever needed.
        # Every column of p equals the per-row logit (w replicated across lanes).
        p = jnp.dot(xc, w_ref[...], preferred_element_type=jnp.float32)  # (SUB, 128)
        # Canonical XLU transpose of the small (SUB,128) tile; row 0 of the result is
        # the lane-dense logit vector for this chunk (all rows are identical).
        row = p.T[0:1, :]                                        # (1, SUB)
        o_ref[:, c * sub_rows:(c + 1) * sub_rows] = (
            jax.nn.sigmoid(row + b).astype(o_ref.dtype))


def _round_up(x, m):
    return (x + m - 1) // m * m


def _round_down(x, m):
    return x // m * m


def _choose_block_b(dim):
    """Batch-tile rows: ~4 MiB of *real* HBM bytes per step, <=8 MiB padded VMEM per
    buffer, <=8192 rows, multiple of the 256-row sub-chunk."""
    d_pad = _round_up(max(dim, _LANES), _LANES)
    by_real_bytes = (4 * 1024 * 1024) // (dim * 4)
    by_vmem_bytes = (8 * 1024 * 1024) // (d_pad * 4)
    tb = min(by_real_bytes, by_vmem_bytes, 8192)
    return max(_SUB, _round_down(tb, _SUB))


def mean_embedding_classifier(x, weight, bias):
    """Equivalent of sigmoid(nn.Linear(embedding_dim, 1)(x)).

    Args:
      x:      (B, D) float32
      weight: (1, D) float32  (nn.Linear.weight layout)
      bias:   (1,)   float32  (nn.Linear.bias)
    Returns:
      (B, 1) float32
    """
    B, D = x.shape
    assert weight.shape == (1, D)

    block_b = _choose_block_b(D)
    if B < _SUB:
        # Tiny batch: pad up to one 256-row tile (negligible at this size).
        x_in = jnp.pad(x, ((0, _SUB - B), (0, 0)))
        block_b, b_in = _SUB, _SUB
    else:
        block_b = min(block_b, _round_down(B, _SUB))
        if B >= 2 * _SUB:
            # Keep >=2 grid steps so both v7x TensorCores get work on the
            # "parallel" axis; neutral on single-core v5e / v6e.
            block_b = min(block_b, max(_SUB, _round_down(B // 2, _SUB)))
        x_in, b_in = x, B

    n_tiles = pl.cdiv(b_in, block_b)

    # Stationary MXU operand: weight column replicated across the 128 output lanes
    # (tiny: D*512 bytes, fetched once since its block index never changes).
    w_rep = jnp.broadcast_to(weight.reshape(D, 1), (D, _LANES)).astype(jnp.float32)
    bias2d = bias.reshape(1, 1).astype(jnp.float32)

    kernel = functools.partial(_mean_emb_classifier_kernel, sub_rows=_SUB)

    out = pl.pallas_call(
        kernel,
        out_shape=jax.ShapeDtypeStruct((n_tiles, block_b), jnp.float32),
        grid_spec=pl.GridSpec(
            grid=(n_tiles,),
            in_specs=[
                pl.BlockSpec((block_b, D), lambda i: (i, 0)),
                pl.BlockSpec((D, _LANES), lambda i: (0, 0)),
                pl.BlockSpec(memory_space=pltpu.MemorySpace.SMEM),
            ],
            out_specs=pl.BlockSpec((1, block_b), lambda i: (i, 0)),
        ),
        compiler_params=pltpu.CompilerParams(
            dimension_semantics=("parallel",),
            vmem_limit_bytes=48 * 1024 * 1024,
        ),
        cost_estimate=pl.CostEstimate(
            flops=2 * b_in * D,
            transcendentals=b_in,
            bytes_accessed=b_in * D * 4 + D * _LANES * 4 + n_tiles * block_b * 4,
        ),
    )(x_in, w_rep, bias2d)

    # Lane-dense (n_tiles, block_b) rows -> (B, 1) column; drop padded / partial rows.
    return out.reshape(n_tiles * block_b)[:B].reshape(B, 1)


if __name__ == "__main__":
    B = 8          # batch size
    D = 32         # embedding_dim

    key = jax.random.PRNGKey(0)
    kx, kw, kb = jax.random.split(key, 3)

    # Deterministic parameter init mimicking nn.Linear default (uniform +-1/sqrt(D)).
    bound = 1.0 / jnp.sqrt(jnp.float32(D))
    weight = jax.random.uniform(kw, (1, D), jnp.float32, -bound, bound)
    bias = jax.random.uniform(kb, (1,), jnp.float32, -bound, bound)

    x = jax.random.normal(kx, (B, D), jnp.float32)

    out = mean_embedding_classifier(x, weight, bias)
    out = jax.block_until_ready(out)

    # Pure-JAX reference check.
    ref = jax.nn.sigmoid(x @ weight.T + bias)
    assert out.shape == (B, 1)
    assert jnp.allclose(out, ref, atol=1e-5, rtol=1e-5)

    print("KERNEL_OK")
</pallas_src>

<mosaic_0001>
module attributes {stable_mosaic.version = 11 : i64} {
  func.func @_mean_emb_classifier_kernel(%arg0: i32, %arg1: memref<256x32xf32, #tpu.memory_space<vmem>>, %arg2: memref<32x128xf32, #tpu.memory_space<vmem>>, %arg3: memref<1x1xf32, #tpu.memory_space<smem>>, %arg4: memref<1x256xf32, #tpu.memory_space<vmem>>) attributes {dimension_semantics = [#tpu.dimension_semantics<parallel>], iteration_bounds = array<i64: 1>, scalar_prefetch = 0 : i64, scratch_operands = 0 : i64, tpu.core_type = #tpu.core_type<tc>, window_params = [{transform_indices = @transform_0, window_bounds = array<i64: 256, 32>}, {pipeline_mode = #tpu.pipeline_mode<synchronous>, transform_indices = @transform_1, window_bounds = array<i64: 32, 128>}, {transform_indices = @transform_2, window_bounds = array<i64: 1, 1>}, {transform_indices = @transform_3, window_bounds = array<i64: 1, 256>}]} {
    %c0 = arith.constant 0 : index
    %c0_0 = arith.constant 0 : index
    %0 = memref.load %arg3[%c0, %c0_0] : memref<1x1xf32, #tpu.memory_space<smem>>
    %c0_1 = arith.constant 0 : index
    %c0_2 = arith.constant 0 : index
    %1 = vector.load %arg1[%c0_1, %c0_2] : memref<256x32xf32, #tpu.memory_space<vmem>>, vector<256x32xf32>
    %c0_3 = arith.constant 0 : index
    %c0_4 = arith.constant 0 : index
    %2 = vector.load %arg2[%c0_3, %c0_4] : memref<32x128xf32, #tpu.memory_space<vmem>>, vector<32x128xf32>
    %cst = arith.constant dense<0.000000e+00> : vector<256x128xf32>
    %3 = tpu.matmul %1, %2, %cst {dimension_numbers = #tpu.dot_dimension_numbers<[1], [0], [0], [1], [0, 0, 1, 1], [], []>} : vector<256x32xf32>, vector<32x128xf32>, vector<256x128xf32> -> vector<256x128xf32>
    %4 = tpu.transpose %3, [1, 0] : vector<256x128xf32> -> vector<128x256xf32>
    %5 = vector.extract_strided_slice %4 {offsets = [0, 0], sizes = [1, 256], strides = [1, 1]} : vector<128x256xf32> to vector<1x256xf32>
    %6 = vector.broadcast %0 : f32 to vector<1x256xf32>
    %7 = arith.addf %5, %6 : vector<1x256xf32>
    %8 = arith.negf %7 : vector<1x256xf32>
    %9 = math.exp %8 : vector<1x256xf32>
    %cst_5 = arith.constant 1.000000e+00 : f32
    %10 = vector.broadcast %cst_5 : f32 to vector<1x256xf32>
    %11 = arith.addf %10, %9 : vector<1x256xf32>
    %12 = arith.divf %10, %11 : vector<1x256xf32>
    %c0_6 = arith.constant 0 : index
    %c0_7 = arith.constant 0 : index
    %13 = vector.load %arg4[%c0_6, %c0_7] : memref<1x256xf32, #tpu.memory_space<vmem>>, vector<1x256xf32>
    tpu.vector_store %arg4[%c0_6, %c0_7], %12 {strides = array<i32>} : memref<1x256xf32, #tpu.memory_space<vmem>>, vector<1x256xf32>,
    return
  }
  func.func @transform_0(%arg0: i32) -> (i32, i32) {
    %c0_i32 = arith.constant 0 : i32
    %c0_i32_0 = arith.constant 0 : i32
    return %arg0, %c0_i32 : i32, i32
  }
  func.func @transform_1(%arg0: i32) -> (i32, i32) {
    %c0_i32 = arith.constant 0 : i32
    %c0_i32_0 = arith.constant 0 : i32
    %c0_i32_1 = arith.constant 0 : i32
    return %c0_i32, %c0_i32_0 : i32, i32
  }
  func.func @transform_2(%arg0: i32) -> (i32, i32) {
    %c0_i32 = arith.constant 0 : i32
    %c0_i32_0 = arith.constant 0 : i32
    %c0_i32_1 = arith.constant 0 : i32
    return %c0_i32, %c0_i32_0 : i32, i32
  }
  func.func @transform_3(%arg0: i32) -> (i32, i32) {
    %c0_i32 = arith.constant 0 : i32
    %c0_i32_0 = arith.constant 0 : i32
    return %arg0, %c0_i32 : i32, i32
  }
}

</mosaic_0001>

<bundles_post_ra>
// kernel: tpu_custom_call.1
= control target key start
LH: loop header
LB: loop body
LE: loop exit
PB: predicated region body
PF: predicated region fallthrough
CT: control target
= control target key end

     0   :  { %vm53_vm0 = vcmask 261120   ;;  %s840_s0 = inlined_call_operand.vmem [shape: f32[256,32], index: 0, kind: input, shape index: {}]   ;;  %s841_s1 = inlined_call_operand.vmem [shape: f32[32,128], index: 1, kind: input, shape index: {}]   ;;  %s842_s2 = inlined_call_operand.<no memory space> [shape: f32[1,1], index: 2, kind: input, shape index: {}]   ;;  %s843_s3 = inlined_call_operand.hbm [shape: f32[1,256], index: 3, kind: output, shape index: {}]  }
   0x1   :  { %v49_v0 = vld [vmem:[%s841_s1] sm:$0xff]  ;;  %v50_v1 = vld [vmem:[%s841_s1 + $0x8] sm:$0xff]  ;;  %v51_v2 = vld [vmem:[%s841_s1 + $0x10] sm:$0xff] }
   0x2   :  { %v617_v3 = vpack.c.bf16 %v50_v1, %v49_v0  ;;  %v52_v4 = vld [vmem:[%s841_s1 + $0x18] sm:$0xff]  ;;  %v17_v5 = vld [vmem:[%s840_s0] sm:$0xff]  ;;  %v18_v8 = vld [vmem:[%s840_s0 + $0x8] sm:$0xff] }
   0x3   :  { %v33_v6 = vld [vmem:[%s840_s0 + $0x80] sm:$0xff]  ;;  %v621_v7 = vpack.c.bf16 %v52_v4, %v51_v2  ;;  %569 = vmatprep.mubr.msk.f32.mxu0 %vm53_vm0, %v17_v5  ;;  %v34_v9 = vld [vmem:[%s840_s0 + $0x88] sm:$0xff]  ;;  %v19_v10 = vld [vmem:[%s840_s0 + $0x10] sm:$0xff] }
   0x4   :  { %593 = vmatprep.mubr.msk.f32.mxu1 %vm53_vm0, %v33_v6  ;;  %618 = vmatprep.subr.bf16.mxu0 %v617_v3  ;;  %v35_v11 = vld [vmem:[%s840_s0 + $0x90] sm:$0xff]  ;;  %v20_v12 = vld [vmem:[%s840_s0 + $0x18] sm:$0xff] }
   0x5   :  { %625 = vmatprep.subr.bf16.mxu1 %v617_v3  ;;  %620 = vmatpush3.bf16.msra.mxu0 %v617_v3  ;;  %v36_v13 = vld [vmem:[%s840_s0 + $0x98] sm:$0xff] }
   0x6   :  { %627 = vmatpush3.bf16.msra.mxu1 %v617_v3  ;;  %622 = vmatprep.subr.bf16.mxu0 %v621_v7 }
   0x7   :  { %626 = vmatprep.subr.bf16.mxu1 %v621_v7 }
   0x9   :  { %624 = vmatpush3.bf16.msra.mxu0 %v621_v7 }
   0xa   :  { %628 = vmatpush3.bf16.msra.mxu1 %v621_v7 }
   0xc   :  { %570 = vmatmul.mubr.msk.f32.vlgmr.msra.gmra.mrb[0].mxu0 %vm53_vm0, %v18_v8 }
   0xd   :  { %594 = vmatmul.mubr.msk.f32.vlgmr.msra.gmra.mrb[0].mxu1 %vm53_vm0, %v34_v9  ;;  %572 = vmatprep.mubr.msk.f32.mxu0 %vm53_vm0, %v19_v10 }
   0xe   :  { %596 = vmatprep.mubr.msk.f32.mxu1 %vm53_vm0, %v35_v11 }
   0xf   :  { %9 = vsyncpa [#allocation4], 0  ;;  %v21_v14 = vld [vmem:[%s840_s0 + $0x20] sm:$0xff]  ;;  %v22_v16 = vld [vmem:[%s840_s0 + $0x28] sm:$0xff]  ;;  %v439_v6 = vstv %s842_s2  ;;  %s664_s2 = smov [#allocation3]  }
  0x10   :  { %v37_v15 = vld [vmem:[%s840_s0 + $0xa0] sm:$0xff]  ;;  %573 = vmatmul.mubr.msk.f32.gmra.mrb[2].mxu0 %vm53_vm0, %v20_v12  ;;  %v38_v17 = vld [vmem:[%s840_s0 + $0xa8] sm:$0xff]  ;;  %v23_v18 = vld [vmem:[%s840_s0 + $0x30] sm:$0xff]  ;;  %s483_s28 = sshll.u32 %s664_s2, 4  ;;  %s484_s28 = int_to_ptr.vmem [resolvable:$true] %s483_s28 }
  0x11   :  { %597 = vmatmul.mubr.msk.f32.gmra.mrb[2].mxu1 %vm53_vm0, %v36_v13  ;;  %575 = vmatprep.mubr.msk.f32.mxu0 %vm53_vm0, %v21_v14  ;;  %v39_v19 = vld [vmem:[%s840_s0 + $0xb0] sm:$0xff]  ;;  %v24_v20 = vld [vmem:[%s840_s0 + $0x38] sm:$0xff]  ;;  %v25_v22 = vld [vmem:[%s840_s0 + $0x40] sm:$0xff]  ;;  %s639_s29 = scalar_lea.vmem %s484_s28, 32  ;;  %p644_p1 = scmp.lt.s32.totalorder %s484_s28, %s484_s28 }
  0x12   :  { %599 = vmatprep.mubr.msk.f32.mxu1 %vm53_vm0, %v37_v15  ;;  %v40_v21 = vld [vmem:[%s840_s0 + $0xb8] sm:$0xff]  ;;  %v41_v23 = vld [vmem:[%s840_s0 + $0xc0] sm:$0xff]  ;;  %v26_v24 = vld [vmem:[%s840_s0 + $0x48] sm:$0xff]  ;;  %p640_p0 = scmp.ne.s32.totalorder %s484_s28, %s639_s29  ;;  %p645_p2 = scmp.lt.s32.totalorder %s639_s29, %s639_s29 }
  0x13   :  { %v42_v25 = vld [vmem:[%s840_s0 + $0xc8] sm:$0xff]  ;;  %v27_v26 = vld [vmem:[%s840_s0 + $0x50] sm:$0xff]  ;;  %v28_v28 = vld [vmem:[%s840_s0 + $0x58] sm:$0xff] }
  0x14   :  { %576 = vmatmul.mubr.msk.f32.gmra.mrb[4].mxu0 %vm53_vm0, %v22_v16  ;;  %v43_v27 = vld [vmem:[%s840_s0 + $0xd0] sm:$0xff]  ;;  %v44_v29 = vld [vmem:[%s840_s0 + $0xd8] sm:$0xff]  ;;  %v29_v30 = vld [vmem:[%s840_s0 + $0x60] sm:$0xff]  ;;  %p646_p3 = por %p645_p2, %p644_p1 }
  0x15   :  { %600 = vmatmul.mubr.msk.f32.gmra.mrb[4].mxu1 %vm53_vm0, %v38_v17  ;;  %578 = vmatprep.mubr.msk.f32.mxu0 %vm53_vm0, %v23_v18  ;;  %v45_v31 = vld [vmem:[%s840_s0 + $0xe0] sm:$0xff]  ;;  %v30_v32 = vld [vmem:[%s840_s0 + $0x68] sm:$0xff]  ;;  %v31_v34 = vld [vmem:[%s840_s0 + $0x70] sm:$0xff]  ;;  %v663_v17 = vmov 1966171168  }
  0x16   :  { %602 = vmatprep.mubr.msk.f32.mxu1 %vm53_vm0, %v39_v19  ;;  %v46_v33 = vld [vmem:[%s840_s0 + $0xe8] sm:$0xff]  ;;  %v47_v35 = vld [vmem:[%s840_s0 + $0xf0] sm:$0xff]  ;;  %v32_v36 = vld [vmem:[%s840_s0 + $0x78] sm:$0xff]  ;;  %v458_v18 = vunpack.c.l.s4 %v663_v17  ;;  %v460_v19 = vlaneseq  ;;  %p647_p4 = pnand %p646_p3, %p640_p0 }
  0x17   :  { %v48_v37 = vld [vmem:[%s840_s0 + $0xf8] sm:$0xff] }
  0x18   :  { %579 = vmatmul.mubr.msk.f32.gmra.mrb[6].mxu0 %vm53_vm0, %v24_v20  ;;  %v459_v20 = vunpack.c.0.s8 %v458_v18  ;;  %vm474_vm1 = vcmp.lt.s32.totalorder %v460_v19, 256 }
  0x19   :  { %603 = vmatmul.mubr.msk.f32.gmra.mrb[6].mxu1 %vm53_vm0, %v40_v21  ;;  %581 = vmatprep.mubr.msk.f32.mxu0 %vm53_vm0, %v25_v22  ;;  %v461_v21 = vshrl.u32 %v460_v19, 7 }
  0x1a   :  { %605 = vmatprep.mubr.msk.f32.mxu1 %vm53_vm0, %v41_v23 }
  0x1b   :  { %v462_v23 = vsub.s32 %v459_v20, %v461_v21 }
  0x1c   :  { %582 = vmatmul.mubr.msk.f32.gmra.mrb[8].mxu0 %vm53_vm0, %v26_v24 }
  0x1d   :  { %606 = vmatmul.mubr.msk.f32.gmra.mrb[8].mxu1 %vm53_vm0, %v42_v25  ;;  %584 = vmatprep.mubr.msk.f32.mxu0 %vm53_vm0, %v27_v26 }
  0x1e   :  { %608 = vmatprep.mubr.msk.f32.mxu1 %vm53_vm0, %v43_v27 }
  0x20   :  { %585 = vmatmul.mubr.msk.f32.gmra.mrb[10].mxu0 %vm53_vm0, %v28_v28 }
  0x21   :  { %609 = vmatmul.mubr.msk.f32.gmra.mrb[10].mxu1 %vm53_vm0, %v44_v29  ;;  %587 = vmatprep.mubr.msk.f32.mxu0 %vm53_vm0, %v29_v30 }
  0x22   :  { %611 = vmatprep.mubr.msk.f32.mxu1 %vm53_vm0, %v45_v31 }
  0x24   :  { %588 = vmatmul.mubr.msk.f32.gmra.mrb[12].mxu0 %vm53_vm0, %v30_v32 }
  0x25   :  { %612 = vmatmul.mubr.msk.f32.gmra.mrb[12].mxu1 %vm53_vm0, %v46_v33  ;;  %590 = vmatprep.mubr.msk.f32.mxu0 %vm53_vm0, %v31_v34 }
  0x26   :  { %614 = vmatprep.mubr.msk.f32.mxu1 %vm53_vm0, %v47_v35 }
  0x28   :  { %591 = vmatmul.mubr.msk.f32.gmra.mrb[14].mxu0 %vm53_vm0, %v32_v36 }
  0x29   :  { %615 = vmatmul.mubr.msk.f32.gmra.mrb[14].mxu1 %vm53_vm0, %v48_v37 }
  0xdf   :  { %v571_v38 = vpop.f32.mrb[0].mxu0 }
  0xe0   :  { %v595_v39 = vpop.f32.mrb[0].mxu1  ;;  %v216_v40 = vpop.f32.mrb[1].mxu0 }
  0xe1   :  { %v296_v41 = vpop.f32.mrb[1].mxu1  ;;  %375 = vxpose.xlu0.b32.start [1/16] (narrow) %v216_v40, 8 }
  0xe2   :  { %407 = vxpose.xlu1.b32.start [1/16] (narrow) %v296_v41, 8 }
  0xe3   :  { %v574_v42 = vpop.f32.mrb[2].mxu0 }
  0xe4   :  { %v598_v43 = vpop.f32.mrb[2].mxu1  ;;  %v226_v44 = vpop.f32.mrb[3].mxu0 }
  0xe5   :  { %v306_v45 = vpop.f32.mrb[3].mxu1  ;;  %376 = vxpose.xlu0.b32.cont [2/16] (narrow) %v571_v38, 8 }
  0xe6   :  { %408 = vxpose.xlu1.b32.cont [2/16] (narrow) %v595_v39, 8 }
  0xe7   :  { %v577_v46 = vpop.f32.mrb[4].mxu0 }
  0xe8   :  { %v601_v47 = vpop.f32.mrb[4].mxu1  ;;  %v236_v48 = vpop.f32.mrb[5].mxu0 }
  0xe9   :  { %v316_v49 = vpop.f32.mrb[5].mxu1  ;;  %377 = vxpose.xlu0.b32.cont [3/16] (narrow) %v226_v44, 8 }
  0xea   :  { %409 = vxpose.xlu1.b32.cont [3/16] (narrow) %v306_v45, 8 }
  0xeb   :  { %v580_v50 = vpop.f32.mrb[6].mxu0 }
  0xec   :  { %v604_v51 = vpop.f32.mrb[6].mxu1  ;;  %v246_v52 = vpop.f32.mrb[7].mxu0 }
  0xed   :  { %v326_v53 = vpop.f32.mrb[7].mxu1  ;;  %378 = vxpose.xlu0.b32.cont [4/16] (narrow) %v574_v42, 8 }
  0xee   :  { %410 = vxpose.xlu1.b32.cont [4/16] (narrow) %v598_v43, 8 }
  0xef   :  { %v583_v54 = vpop.f32.mrb[8].mxu0 }
  0xf0   :  { %v607_v55 = vpop.f32.mrb[8].mxu1  ;;  %v256_v56 = vpop.f32.mrb[9].mxu0 }
  0xf1   :  { %v336_v57 = vpop.f32.mrb[9].mxu1  ;;  %379 = vxpose.xlu0.b32.cont [5/16] (narrow) %v236_v48, 8 }
  0xf2   :  { %411 = vxpose.xlu1.b32.cont [5/16] (narrow) %v316_v49, 8 }
  0xf3   :  { %v586_v58 = vpop.f32.mrb[10].mxu0 }
  0xf4   :  { %v610_v59 = vpop.f32.mrb[10].mxu1  ;;  %v266_v60 = vpop.f32.mrb[11].mxu0 }
  0xf5   :  { %v346_v61 = vpop.f32.mrb[11].mxu1  ;;  %380 = vxpose.xlu0.b32.cont [6/16] (narrow) %v577_v46, 8 }
  0xf6   :  { %412 = vxpose.xlu1.b32.cont [6/16] (narrow) %v601_v47, 8 }
  0xf7   :  { %v589_v62 = vpop.f32.mrb[12].mxu0 }
  0xf8   :  { %v613_v63 = vpop.f32.mrb[12].mxu1  ;;  %v276_v0 = vpop.f32.mrb[13].mxu0 }
  0xf9   :  { %v356_v1 = vpop.f32.mrb[13].mxu1  ;;  %381 = vxpose.xlu0.b32.cont [7/16] (narrow) %v246_v52, 8 }
  0xfa   :  { %413 = vxpose.xlu1.b32.cont [7/16] (narrow) %v326_v53, 8 }
  0xfb   :  { %v592_v2 = vpop.f32.mrb[14].mxu0 }
  0xfc   :  { %v616_v3 = vpop.f32.mrb[14].mxu1  ;;  %v286_v4 = vpop.f32.mrb[15].mxu0 }
  0xfd   :  { %v366_v5 = vpop.f32.mrb[15].mxu1  ;;  %382 = vxpose.xlu0.b32.cont [8/16] (narrow) %v580_v50, 8 }
  0xfe   :  { %414 = vxpose.xlu1.b32.cont [8/16] (narrow) %v604_v51, 8 }
 0x101   :  { %383 = vxpose.xlu0.b32.cont [9/16] (narrow) %v256_v56, 8 }
 0x102   :  { %415 = vxpose.xlu1.b32.cont [9/16] (narrow) %v336_v57, 8 }
 0x105   :  { %384 = vxpose.xlu0.b32.cont [10/16] (narrow) %v583_v54, 8 }
 0x106   :  { %416 = vxpose.xlu1.b32.cont [10/16] (narrow) %v607_v55, 8 }
 0x109   :  { %385 = vxpose.xlu0.b32.cont [11/16] (narrow) %v266_v60, 8 }
 0x10a   :  { %417 = vxpose.xlu1.b32.cont [11/16] (narrow) %v346_v61, 8 }
 0x10d   :  { %386 = vxpose.xlu0.b32.cont [12/16] (narrow) %v586_v58, 8 }
 0x10e   :  { %418 = vxpose.xlu1.b32.cont [12/16] (narrow) %v610_v59, 8 }
 0x111   :  { %387 = vxpose.xlu0.b32.cont [13/16] (narrow) %v276_v0, 8 }
 0x112   :  { %419 = vxpose.xlu1.b32.cont [13/16] (narrow) %v356_v1, 8 }
 0x115   :  { %388 = vxpose.xlu0.b32.cont [14/16] (narrow) %v589_v62, 8 }
 0x116   :  { %420 = vxpose.xlu1.b32.cont [14/16] (narrow) %v613_v63, 8 }
 0x119   :  { %389 = vxpose.xlu0.b32.cont [15/16] (narrow) %v286_v4, 8 }
 0x11a   :  { %421 = vxpose.xlu1.b32.cont [15/16] (narrow) %v366_v5, 8 }
 0x11d   :  { %390 = vxpose.xlu0.b32.end [16/16] (narrow) %v592_v2, 8 }
 0x11e   :  { %422 = vxpose.xlu1.b32.end [16/16] (narrow) %v616_v3, 8 }
 0x161   :  { %v391_v8 = vpop.trf.xlu0 }
 0x162   :  { %v423_v7 = vpop.trf.xlu1  ;;  %v440_v10 = vadd.f32 %v439_v6, %v391_v8 }
 0x163   :  { %v441_v9 = vadd.f32 %v439_v6, %v423_v7 }
 0x164   :  { %v523_v12 = vmul.f32 -1.442695, %v440_v10 }
 0x165   :  { %v524_v11 = vmul.f32 -1.442695, %v441_v9 }
 0x167   :  { %631 = vpow2.f32 %v524_v11 }
 0x168   :  { %633 = vpow2.f32 %v523_v12 }
 0x171   :  { %v632_v13 = vpop.eup %631 }
 0x172   :  { %v634_v14 = vpop.eup %633  ;;  %v449_v15 = vadd.f32 1.0, %v632_v13 }
 0x173   :  { %v448_v16 = vadd.f32 1.0, %v634_v14 }
 0x174   :  { %635 = vrcp.f32 %v449_v15 }
 0x175   :  { %637 = vrcp.f32 %v448_v16 }
 0x17e   :  { %v636_v22 = vpop.eup %635 }
 0x17f   :  { %v638_v24 = vpop.eup %637 }
 0x180   :  { %v456_v25 = vcombine.low %v638_v24, %v636_v22 }
 0x182   :  { %v463_v26 = vrot.slane %v456_v25, %v462_v23 }
 0x184   :  { %v470_v27 = vrot.slane %v463_v26, %v462_v23 }
 0x186   :  { %476 = vst.msk [vmem:[#allocation3] sm:$0x3] %vm474_vm1, %v470_v27 }
 0x187   :  { %650 = shalt.err (!%p647_p4)
}
 0x188   :  { %s651_s5 = scalar_lea.hbm %s843_s3, 32 }
 0x189   :  { %p652_p5 = scmp.ne.s32.totalorder %s843_s3, %s651_s5  ;;  %p655_p6 = scmp.lt.u32.totalorder %s651_s5, %s843_s3 }
 0x18b   :  { %p657_p7 = pnand %p655_p6, %p652_p5 }
 0x18d   :  { %660 = shalt.err (!%p657_p7)
}
 0x18e   :  { %486 = dma.vmem_to_hbm [thread:$0]  %s484_s28, 32, %s843_s3, [#allocation4]  }
 0x18f   :  { %661 = dma.done.wait [#allocation4], 32  }
 0x190   :  { %662 = vsyncadd [#allocation4], 4294967264 }
 0x191   :  { %490 = vsyncpa [#allocation4], 1 }

</bundles_post_ra>
